<compile_context>
chip_gen: v7x
topology: tpu7x:2x2x1
jax: 0.10.0
libtpu: 0.0.40
codegen_flags: <defaults>
</compile_context>

<pallas_src>
import jax
import jax.numpy as jnp
from jax import lax
from jax.experimental import pallas as pl
from jax.experimental.pallas import tpu as pltpu

BN_EPS = 1e-5


# ----------------------------------------------------------------------------
# In-kernel helpers (trace-time; operate on values / refs)
# ----------------------------------------------------------------------------
def _dw_plane(xp, tap, kh, kw, stride, dilation, Ho, Wo):
    """Depthwise conv of one already-padded (Hp, Wp) plane.

    xp:  (Hp, Wp) f32 value
    tap: callable t -> scalar weight for flattened kernel position t
    """
    acc = jnp.zeros((Ho, Wo), jnp.float32)
    for i in range(kh):                      # small static tap loops
        for j in range(kw):
            h0 = i * dilation
            w0 = j * dilation
            # TODO(synk): stride > 1 uses strided value slices (untuned path);
            # the optimized/tested path is stride == 1 (plain slices).
            patch = xp[h0:h0 + (Ho - 1) * stride + 1:stride,
                       w0:w0 + (Wo - 1) * stride + 1:stride]
            acc = acc + patch * tap(i * kw + j)
    return acc


def _pointwise_accumulate(o_ref, pw_ref, ci, y, Cout):
    """Accumulate the 1x1-conv contribution of channel ci into the resident
    output block.  o_ref: (1, Cout, Ho, Wo); pw_ref: (Cout, Cin) in SMEM."""
    @pl.when(ci == 0)
    def _():
        o_ref[...] = jnp.zeros_like(o_ref)

    for co in range(Cout):                   # VPU scalar-FMA; Cin/Cout small
        o_ref[0, co] = o_ref[0, co] + pw_ref[co, ci] * y


# ----------------------------------------------------------------------------
# Parameter folding helpers
# ----------------------------------------------------------------------------
def _bn_fold(bn):
    gamma, beta, mean, var = bn
    scale = gamma / jnp.sqrt(var + BN_EPS)
    bias = beta - mean * scale
    return scale, bias


# ----------------------------------------------------------------------------
# Public forward (fused Pallas kernel)
# ----------------------------------------------------------------------------
def c3block_forward(x_nchw, params, *, kSize, stride=1, d=1):
    """Matches C3block.forward.  x_nchw: (N, nIn, H, W) -> (N, nOut, Ho, Wo)."""
    x = x_nchw.astype(jnp.float32)
    N, C, H, W = x.shape
    wpw = params['pw'][:, :, 0, 0].astype(jnp.float32)          # (Cout, Cin)
    Cout = wpw.shape[0]
    padding = ((kSize - 1) // 2) * d
    s = stride

    if d == 1:
        taps = params['dw'][:, 0].reshape(C, kSize * kSize).astype(jnp.float32)
        Hp, Wp = H + 2 * padding, W + 2 * padding
        Ho = (Hp - kSize) // s + 1
        Wo = (Wp - kSize) // s + 1

        def kernel(x_ref, t_ref, pw_ref, o_ref, pbuf):
            ci = pl.program_id(1)

            @pl.when(ci == 0)                # borders stay zero across channels
            def _():
                pbuf[...] = jnp.zeros_like(pbuf)

            pbuf[pl.ds(padding, H), pl.ds(padding, W)] = x_ref[0, 0]
            y = _dw_plane(pbuf[...], lambda t: t_ref[ci, t],
                          kSize, kSize, s, 1, Ho, Wo)
            _pointwise_accumulate(o_ref, pw_ref, ci, y, Cout)

        operands = (x, taps, wpw)
        n_smem = 2
        scratch = [pltpu.VMEM((Hp, Wp), jnp.float32)]
    else:
        ck = 2 * d - 1
        t1 = params['w1'][:, 0, :, 0]                            # (C, ck)
        t2 = params['w2'][:, 0, 0, :]                            # (C, ck)
        t3 = params['w3'][:, 0].reshape(C, kSize * kSize)        # (C, k*k)
        taps = jnp.concatenate([t1, t2, t3], axis=1).astype(jnp.float32)
        s1, b1 = _bn_fold(params['bn1'])
        s2, b2 = _bn_fold(params['bn2'])
        affine = jnp.stack([s1, b1, params['a1'], s2, b2], 0).astype(jnp.float32)

        # Stage shapes (stride applied per stage, matching the PyTorch module).
        HpA, WpA = H + 2 * (padding - 1), W
        H1 = (HpA - ck) // s + 1
        W1 = (WpA - 1) // s + 1
        HpB, WpB = H1, W1 + 2 * (padding - 1)
        H2 = (HpB - 1) // s + 1
        W2 = (WpB - ck) // s + 1
        HpC, WpC = H2 + 2 * padding, W2 + 2 * padding
        keff = d * (kSize - 1) + 1
        Ho = (HpC - keff) // s + 1
        Wo = (WpC - keff) // s + 1

        def kernel(x_ref, t_ref, af_ref, pw_ref, o_ref, bufA, bufB, bufC):
            ci = pl.program_id(1)

            @pl.when(ci == 0)                # zero padding borders once per image
            def _():
                bufA[...] = jnp.zeros_like(bufA)
                bufB[...] = jnp.zeros_like(bufB)
                bufC[...] = jnp.zeros_like(bufC)

            # stage 1: (ck, 1) depthwise + folded BN + PReLU
            bufA[pl.ds(padding - 1, H), :] = x_ref[0, 0]
            y = _dw_plane(bufA[...], lambda t: t_ref[ci, t], ck, 1, s, 1, H1, W1)
            y = y * af_ref[0, ci] + af_ref[1, ci]
            y = jnp.where(y >= 0.0, y, y * af_ref[2, ci])
            # stage 2: (1, ck) depthwise + folded BN
            bufB[:, pl.ds(padding - 1, W1)] = y
            y = _dw_plane(bufB[...], lambda t: t_ref[ci, ck + t], 1, ck, s, 1, H2, W2)
            y = y * af_ref[3, ci] + af_ref[4, ci]
            # stage 3: dilated (kSize, kSize) depthwise
            bufC[pl.ds(padding, H2), pl.ds(padding, W2)] = y
            y = _dw_plane(bufC[...], lambda t: t_ref[ci, 2 * ck + t],
                          kSize, kSize, s, d, Ho, Wo)
            # fused 1x1 pointwise conv (reduction over ci into resident o_ref)
            _pointwise_accumulate(o_ref, pw_ref, ci, y, Cout)

        operands = (x, taps, affine, wpw)
        n_smem = 3
        scratch = [pltpu.VMEM((HpA, WpA), jnp.float32),
                   pltpu.VMEM((HpB, WpB), jnp.float32),
                   pltpu.VMEM((HpC, WpC), jnp.float32)]

    smem = pl.BlockSpec(memory_space=pltpu.MemorySpace.SMEM)
    # TODO(synk): for very large H*W planes, additionally tile output rows
    # (manual halo DMA) so one plane never exceeds the per-core VMEM budget.
    # TODO(synk): on v6e/v7x the plane math could run in bf16 (keep f32 accum);
    # kept f32 here so the same code is optimal on v5e as well.
    return pl.pallas_call(
        kernel,
        out_shape=jax.ShapeDtypeStruct((N, Cout, Ho, Wo), jnp.float32),
        grid=(N, C),
        in_specs=[pl.BlockSpec((1, 1, H, W), lambda n, c: (n, c, 0, 0))]
                 + [smem] * n_smem,
        out_specs=pl.BlockSpec((1, Cout, Ho, Wo), lambda n, c: (n, 0, 0, 0)),
        scratch_shapes=scratch,
        compiler_params=pltpu.CompilerParams(
            dimension_semantics=("parallel", "arbitrary"),
            vmem_limit_bytes=32 * 1024 * 1024),
    )(*operands)


# ----------------------------------------------------------------------------
# Deterministic parameter initialization (matches PyTorch module shapes)
# ----------------------------------------------------------------------------
def init_params(key, nIn, nOut, kSize, d):
    ks = jax.random.split(key, 8)

    def normal(k, shape, s=0.3):
        return (s * jax.random.normal(k, shape)).astype(jnp.float32)

    if d == 1:
        return {'dw': normal(ks[0], (nIn, 1, kSize, kSize)),
                'pw': normal(ks[1], (nOut, nIn, 1, 1))}

    ck = 2 * d - 1

    def bn(k):
        k1, k2, k3, k4 = jax.random.split(k, 4)
        gamma = (1.0 + 0.1 * jax.random.normal(k1, (nIn,))).astype(jnp.float32)
        beta = (0.1 * jax.random.normal(k2, (nIn,))).astype(jnp.float32)
        mean = (0.1 * jax.random.normal(k3, (nIn,))).astype(jnp.float32)
        var = jax.random.uniform(k4, (nIn,), minval=0.5, maxval=1.5).astype(jnp.float32)
        return (gamma, beta, mean, var)

    return {
        'w1': normal(ks[0], (nIn, 1, ck, 1)),
        'bn1': bn(ks[1]),
        'a1': (0.25 + 0.05 * jax.random.normal(ks[2], (nIn,))).astype(jnp.float32),
        'w2': normal(ks[3], (nIn, 1, 1, ck)),
        'bn2': bn(ks[4]),
        'w3': normal(ks[5], (nIn, 1, kSize, kSize)),
        'pw': normal(ks[6], (nOut, nIn, 1, 1)),
    }


# ----------------------------------------------------------------------------
# Pure-JAX reference (lax convs) for correctness check
# ----------------------------------------------------------------------------
def _ref_dw_conv(x, w, stride, padding, dilation):
    C = x.shape[1]
    return lax.conv_general_dilated(
        x, w, window_strides=(stride, stride),
        padding=((padding[0], padding[0]), (padding[1], padding[1])),
        rhs_dilation=(dilation, dilation),
        dimension_numbers=('NCHW', 'OIHW', 'NCHW'),
        feature_group_count=C)


def _ref_bn(x, bn):
    gamma, beta, mean, var = bn
    r = lambda v: v.reshape(1, -1, 1, 1)
    return (x - r(mean)) / jnp.sqrt(r(var) + BN_EPS) * r(gamma) + r(beta)


def _ref_prelu(x, a):
    a = a.reshape(1, -1, 1, 1)
    return jnp.where(x >= 0, x, a * x)


def c3block_reference(x, params, *, kSize, stride=1, d=1):
    padding = ((kSize - 1) // 2) * d
    if d == 1:
        y = _ref_dw_conv(x, params['dw'], stride, (padding, padding), 1)
    else:
        y = _ref_dw_conv(x, params['w1'], stride, (padding - 1, 0), 1)
        y = _ref_prelu(_ref_bn(y, params['bn1']), params['a1'])
        y = _ref_dw_conv(y, params['w2'], stride, (0, padding - 1), 1)
        y = _ref_bn(y, params['bn2'])
        y = _ref_dw_conv(y, params['w3'], stride, (padding, padding), d)
    return lax.conv_general_dilated(
        y, params['pw'], (1, 1), ((0, 0), (0, 0)),
        dimension_numbers=('NCHW', 'OIHW', 'NCHW'))


# ----------------------------------------------------------------------------
if __name__ == "__main__":
    key = jax.random.PRNGKey(0)
    kx, kp1, kp2 = jax.random.split(key, 3)

    N, nIn, H, W = 2, 4, 16, 16
    nOut, kSize = 8, 3
    x = jax.random.normal(kx, (N, nIn, H, W), dtype=jnp.float32)

    # d == 1 branch: depthwise kxk conv -> 1x1 pointwise conv (fused)
    p1 = init_params(kp1, nIn, nOut, kSize, d=1)
    out1 = c3block_forward(x, p1, kSize=kSize, stride=1, d=1)
    ref1 = c3block_reference(x, p1, kSize=kSize, stride=1, d=1)

    # d == 2 branch: combine convs + BN + PReLU + dilated dw + pointwise (fused)
    p2 = init_params(kp2, nIn, nOut, kSize, d=2)
    out2 = c3block_forward(x, p2, kSize=kSize, stride=1, d=2)
    ref2 = c3block_reference(x, p2, kSize=kSize, stride=1, d=2)

    jax.block_until_ready((out1, out2))

    assert out1.shape == (N, nOut, H, W), out1.shape
    assert out2.shape == (N, nOut, H, W), out2.shape
    assert jnp.allclose(out1, ref1, atol=1e-3, rtol=1e-3), \
        float(jnp.max(jnp.abs(out1 - ref1)))
    assert jnp.allclose(out2, ref2, atol=1e-3, rtol=1e-3), \
        float(jnp.max(jnp.abs(out2 - ref2)))

    print("KERNEL_OK")
</pallas_src>

<mosaic_0001>
module attributes {stable_mosaic.version = 11 : i64} {
  func.func @kernel(%arg0: i32, %arg1: i32, %arg2: memref<1x1x16x16xf32, #tpu.memory_space<vmem>>, %arg3: memref<4x9xf32, #tpu.memory_space<smem>>, %arg4: memref<8x4xf32, #tpu.memory_space<smem>>, %arg5: memref<1x8x16x16xf32, #tpu.memory_space<vmem>>, %arg6: memref<18x18xf32, #tpu.memory_space<vmem>>) attributes {dimension_semantics = [#tpu.dimension_semantics<parallel>, #tpu.dimension_semantics<arbitrary>], iteration_bounds = array<i64: 2, 4>, scalar_prefetch = 0 : i64, scratch_operands = 1 : i64, tpu.core_type = #tpu.core_type<tc>, window_params = [{transform_indices = @transform_0, window_bounds = array<i64: 1, 1, 16, 16>}, {transform_indices = @transform_1, window_bounds = array<i64: 4, 9>}, {transform_indices = @transform_2, window_bounds = array<i64: 8, 4>}, {transform_indices = @transform_3, window_bounds = array<i64: 1, 8, 16, 16>}]} {
    %c0_i32 = arith.constant 0 : i32
    %0 = arith.cmpi eq, %arg1, %c0_i32 : i32
    %1 = arith.extui %0 : i1 to i32
    %c0_i32_0 = arith.constant 0 : i32
    %2 = arith.cmpi ne, %1, %c0_i32_0 : i32
    scf.if %2 {
      %cst_83 = arith.constant 0.000000e+00 : f32
      %145 = vector.broadcast %cst_83 : f32 to vector<18x18xf32>
      %c0_84 = arith.constant 0 : index
      %c0_85 = arith.constant 0 : index
      %146 = vector.load %arg6[%c0_84, %c0_85] : memref<18x18xf32, #tpu.memory_space<vmem>>, vector<18x18xf32>
      tpu.vector_store %arg6[%c0_84, %c0_85], %145 {strides = array<i32>} : memref<18x18xf32, #tpu.memory_space<vmem>>, vector<18x18xf32>,
    } else {
    }
    %c0 = arith.constant 0 : index
    %c0_1 = arith.constant 0 : index
    %c0_2 = arith.constant 0 : index
    %c0_3 = arith.constant 0 : index
    %3 = vector.load %arg2[%c0, %c0_1, %c0_2, %c0_3] : memref<1x1x16x16xf32, #tpu.memory_space<vmem>>, vector<1x1x16x16xf32>
    %4 = vector.shape_cast %3 : vector<1x1x16x16xf32> to vector<16x16xf32>
    %c1 = arith.constant 1 : index
    %c1_4 = arith.constant 1 : index
    %5 = vector.load %arg6[%c1, %c1_4] : memref<18x18xf32, #tpu.memory_space<vmem>>, vector<16x16xf32>
    tpu.vector_store %arg6[%c1, %c1_4], %4 {strides = array<i32>} : memref<18x18xf32, #tpu.memory_space<vmem>>, vector<16x16xf32>,
    %c0_5 = arith.constant 0 : index
    %c0_6 = arith.constant 0 : index
    %6 = vector.load %arg6[%c0_5, %c0_6] : memref<18x18xf32, #tpu.memory_space<vmem>>, vector<18x18xf32>
    %cst = arith.constant 0.000000e+00 : f32
    %7 = vector.broadcast %cst : f32 to vector<16x16xf32>
    %8 = vector.extract_strided_slice %6 {offsets = [0, 0], sizes = [16, 16], strides = [1, 1]} : vector<18x18xf32> to vector<16x16xf32>
    %9 = arith.index_cast %arg1 : i32 to index
    %c0_7 = arith.constant 0 : index
    %10 = memref.load %arg3[%9, %c0_7] : memref<4x9xf32, #tpu.memory_space<smem>>
    %11 = vector.broadcast %10 : f32 to vector<16x16xf32>
    %12 = arith.mulf %8, %11 : vector<16x16xf32>
    %13 = arith.addf %7, %12 : vector<16x16xf32>
    %14 = vector.extract_strided_slice %6 {offsets = [0, 1], sizes = [16, 16], strides = [1, 1]} : vector<18x18xf32> to vector<16x16xf32>
    %15 = arith.index_cast %arg1 : i32 to index
    %c1_8 = arith.constant 1 : index
    %16 = memref.load %arg3[%15, %c1_8] : memref<4x9xf32, #tpu.memory_space<smem>>
    %17 = vector.broadcast %16 : f32 to vector<16x16xf32>
    %18 = arith.mulf %14, %17 : vector<16x16xf32>
    %19 = arith.addf %13, %18 : vector<16x16xf32>
    %20 = vector.extract_strided_slice %6 {offsets = [0, 2], sizes = [16, 16], strides = [1, 1]} : vector<18x18xf32> to vector<16x16xf32>
    %21 = arith.index_cast %arg1 : i32 to index
    %c2 = arith.constant 2 : index
    %22 = memref.load %arg3[%21, %c2] : memref<4x9xf32, #tpu.memory_space<smem>>
    %23 = vector.broadcast %22 : f32 to vector<16x16xf32>
    %24 = arith.mulf %20, %23 : vector<16x16xf32>
    %25 = arith.addf %19, %24 : vector<16x16xf32>
    %26 = vector.extract_strided_slice %6 {offsets = [1, 0], sizes = [16, 16], strides = [1, 1]} : vector<18x18xf32> to vector<16x16xf32>
    %27 = arith.index_cast %arg1 : i32 to index
    %c3 = arith.constant 3 : index
    %28 = memref.load %arg3[%27, %c3] : memref<4x9xf32, #tpu.memory_space<smem>>
    %29 = vector.broadcast %28 : f32 to vector<16x16xf32>
    %30 = arith.mulf %26, %29 : vector<16x16xf32>
    %31 = arith.addf %25, %30 : vector<16x16xf32>
    %32 = vector.extract_strided_slice %6 {offsets = [1, 1], sizes = [16, 16], strides = [1, 1]} : vector<18x18xf32> to vector<16x16xf32>
    %33 = arith.index_cast %arg1 : i32 to index
    %c4 = arith.constant 4 : index
    %34 = memref.load %arg3[%33, %c4] : memref<4x9xf32, #tpu.memory_space<smem>>
    %35 = vector.broadcast %34 : f32 to vector<16x16xf32>
    %36 = arith.mulf %32, %35 : vector<16x16xf32>
    %37 = arith.addf %31, %36 : vector<16x16xf32>
    %38 = vector.extract_strided_slice %6 {offsets = [1, 2], sizes = [16, 16], strides = [1, 1]} : vector<18x18xf32> to vector<16x16xf32>
    %39 = arith.index_cast %arg1 : i32 to index
    %c5 = arith.constant 5 : index
    %40 = memref.load %arg3[%39, %c5] : memref<4x9xf32, #tpu.memory_space<smem>>
    %41 = vector.broadcast %40 : f32 to vector<16x16xf32>
    %42 = arith.mulf %38, %41 : vector<16x16xf32>
    %43 = arith.addf %37, %42 : vector<16x16xf32>
    %44 = vector.extract_strided_slice %6 {offsets = [2, 0], sizes = [16, 16], strides = [1, 1]} : vector<18x18xf32> to vector<16x16xf32>
    %45 = arith.index_cast %arg1 : i32 to index
    %c6 = arith.constant 6 : index
    %46 = memref.load %arg3[%45, %c6] : memref<4x9xf32, #tpu.memory_space<smem>>
    %47 = vector.broadcast %46 : f32 to vector<16x16xf32>
    %48 = arith.mulf %44, %47 : vector<16x16xf32>
    %49 = arith.addf %43, %48 : vector<16x16xf32>
    %50 = vector.extract_strided_slice %6 {offsets = [2, 1], sizes = [16, 16], strides = [1, 1]} : vector<18x18xf32> to vector<16x16xf32>
    %51 = arith.index_cast %arg1 : i32 to index
    %c7 = arith.constant 7 : index
    %52 = memref.load %arg3[%51, %c7] : memref<4x9xf32, #tpu.memory_space<smem>>
    %53 = vector.broadcast %52 : f32 to vector<16x16xf32>
    %54 = arith.mulf %50, %53 : vector<16x16xf32>
    %55 = arith.addf %49, %54 : vector<16x16xf32>
    %56 = vector.extract_strided_slice %6 {offsets = [2, 2], sizes = [16, 16], strides = [1, 1]} : vector<18x18xf32> to vector<16x16xf32>
    %57 = arith.index_cast %arg1 : i32 to index
    %c8 = arith.constant 8 : index
    %58 = memref.load %arg3[%57, %c8] : memref<4x9xf32, #tpu.memory_space<smem>>
    %59 = vector.broadcast %58 : f32 to vector<16x16xf32>
    %60 = arith.mulf %56, %59 : vector<16x16xf32>
    %61 = arith.addf %55, %60 : vector<16x16xf32>
    %c0_i32_9 = arith.constant 0 : i32
    %62 = arith.cmpi eq, %arg1, %c0_i32_9 : i32
    %63 = arith.extui %62 : i1 to i32
    %c0_i32_10 = arith.constant 0 : i32
    %64 = arith.cmpi ne, %63, %c0_i32_10 : i32
    scf.if %64 {
      %cst_83 = arith.constant 0.000000e+00 : f32
      %145 = vector.broadcast %cst_83 : f32 to vector<1x8x16x16xf32>
      %c0_84 = arith.constant 0 : index
      %c0_85 = arith.constant 0 : index
      %c0_86 = arith.constant 0 : index
      %c0_87 = arith.constant 0 : index
      %146 = vector.load %arg5[%c0_84, %c0_85, %c0_86, %c0_87] : memref<1x8x16x16xf32, #tpu.memory_space<vmem>>, vector<1x8x16x16xf32>
      tpu.vector_store %arg5[%c0_84, %c0_85, %c0_86, %c0_87], %145 {strides = array<i32>} : memref<1x8x16x16xf32, #tpu.memory_space<vmem>>, vector<1x8x16x16xf32>,
    } else {
    }
    %c0_11 = arith.constant 0 : index
    %c0_12 = arith.constant 0 : index
    %c0_13 = arith.constant 0 : index
    %c0_14 = arith.constant 0 : index
    %65 = vector.load %arg5[%c0_11, %c0_12, %c0_13, %c0_14] : memref<1x8x16x16xf32, #tpu.memory_space<vmem>>, vector<1x1x16x16xf32>
    %66 = vector.shape_cast %65 : vector<1x1x16x16xf32> to vector<16x16xf32>
    %c0_15 = arith.constant 0 : index
    %67 = arith.index_cast %arg1 : i32 to index
    %68 = memref.load %arg4[%c0_15, %67] : memref<8x4xf32, #tpu.memory_space<smem>>
    %69 = vector.broadcast %68 : f32 to vector<16x16xf32>
    %70 = arith.mulf %69, %61 : vector<16x16xf32>
    %71 = arith.addf %66, %70 : vector<16x16xf32>
    %c0_16 = arith.constant 0 : index
    %c0_17 = arith.constant 0 : index
    %c0_18 = arith.constant 0 : index
    %c0_19 = arith.constant 0 : index
    %72 = vector.load %arg5[%c0_16, %c0_17, %c0_18, %c0_19] : memref<1x8x16x16xf32, #tpu.memory_space<vmem>>, vector<1x1x16x16xf32>
    %73 = vector.shape_cast %72 : vector<1x1x16x16xf32> to vector<16x16xf32>
    %74 = vector.shape_cast %71 : vector<16x16xf32> to vector<1x1x16x16xf32>
    tpu.vector_store %arg5[%c0_16, %c0_17, %c0_18, %c0_19], %74 {strides = array<i32>} : memref<1x8x16x16xf32, #tpu.memory_space<vmem>>, vector<1x1x16x16xf32>,
    %c0_20 = arith.constant 0 : index
    %c1_21 = arith.constant 1 : index
    %c0_22 = arith.constant 0 : index
    %c0_23 = arith.constant 0 : index
    %75 = vector.load %arg5[%c0_20, %c1_21, %c0_22, %c0_23] : memref<1x8x16x16xf32, #tpu.memory_space<vmem>>, vector<1x1x16x16xf32>
    %76 = vector.shape_cast %75 : vector<1x1x16x16xf32> to vector<16x16xf32>
    %c1_24 = arith.constant 1 : index
    %77 = arith.index_cast %arg1 : i32 to index
    %78 = memref.load %arg4[%c1_24, %77] : memref<8x4xf32, #tpu.memory_space<smem>>
    %79 = vector.broadcast %78 : f32 to vector<16x16xf32>
    %80 = arith.mulf %79, %61 : vector<16x16xf32>
    %81 = arith.addf %76, %80 : vector<16x16xf32>
    %c0_25 = arith.constant 0 : index
    %c1_26 = arith.constant 1 : index
    %c0_27 = arith.constant 0 : index
    %c0_28 = arith.constant 0 : index
    %82 = vector.load %arg5[%c0_25, %c1_26, %c0_27, %c0_28] : memref<1x8x16x16xf32, #tpu.memory_space<vmem>>, vector<1x1x16x16xf32>
    %83 = vector.shape_cast %82 : vector<1x1x16x16xf32> to vector<16x16xf32>
    %84 = vector.shape_cast %81 : vector<16x16xf32> to vector<1x1x16x16xf32>
    tpu.vector_store %arg5[%c0_25, %c1_26, %c0_27, %c0_28], %84 {strides = array<i32>} : memref<1x8x16x16xf32, #tpu.memory_space<vmem>>, vector<1x1x16x16xf32>,
    %c0_29 = arith.constant 0 : index
    %c2_30 = arith.constant 2 : index
    %c0_31 = arith.constant 0 : index
    %c0_32 = arith.constant 0 : index
    %85 = vector.load %arg5[%c0_29, %c2_30, %c0_31, %c0_32] : memref<1x8x16x16xf32, #tpu.memory_space<vmem>>, vector<1x1x16x16xf32>
    %86 = vector.shape_cast %85 : vector<1x1x16x16xf32> to vector<16x16xf32>
    %c2_33 = arith.constant 2 : index
    %87 = arith.index_cast %arg1 : i32 to index
    %88 = memref.load %arg4[%c2_33, %87] : memref<8x4xf32, #tpu.memory_space<smem>>
    %89 = vector.broadcast %88 : f32 to vector<16x16xf32>
    %90 = arith.mulf %89, %61 : vector<16x16xf32>
    %91 = arith.addf %86, %90 : vector<16x16xf32>
    %c0_34 = arith.constant 0 : index
    %c2_35 = arith.constant 2 : index
    %c0_36 = arith.constant 0 : index
    %c0_37 = arith.constant 0 : index
    %92 = vector.load %arg5[%c0_34, %c2_35, %c0_36, %c0_37] : memref<1x8x16x16xf32, #tpu.memory_space<vmem>>, vector<1x1x16x16xf32>
    %93 = vector.shape_cast %92 : vector<1x1x16x16xf32> to vector<16x16xf32>
    %94 = vector.shape_cast %91 : vector<16x16xf32> to vector<1x1x16x16xf32>
    tpu.vector_store %arg5[%c0_34, %c2_35, %c0_36, %c0_37], %94 {strides = array<i32>} : memref<1x8x16x16xf32, #tpu.memory_space<vmem>>, vector<1x1x16x16xf32>,
    %c0_38 = arith.constant 0 : index
    %c3_39 = arith.constant 3 : index
    %c0_40 = arith.constant 0 : index
    %c0_41 = arith.constant 0 : index
    %95 = vector.load %arg5[%c0_38, %c3_39, %c0_40, %c0_41] : memref<1x8x16x16xf32, #tpu.memory_space<vmem>>, vector<1x1x16x16xf32>
    %96 = vector.shape_cast %95 : vector<1x1x16x16xf32> to vector<16x16xf32>
    %c3_42 = arith.constant 3 : index
    %97 = arith.index_cast %arg1 : i32 to index
    %98 = memref.load %arg4[%c3_42, %97] : memref<8x4xf32, #tpu.memory_space<smem>>
    %99 = vector.broadcast %98 : f32 to vector<16x16xf32>
    %100 = arith.mulf %99, %61 : vector<16x16xf32>
    %101 = arith.addf %96, %100 : vector<16x16xf32>
    %c0_43 = arith.constant 0 : index
    %c3_44 = arith.constant 3 : index
    %c0_45 = arith.constant 0 : index
    %c0_46 = arith.constant 0 : index
    %102 = vector.load %arg5[%c0_43, %c3_44, %c0_45, %c0_46] : memref<1x8x16x16xf32, #tpu.memory_space<vmem>>, vector<1x1x16x16xf32>
    %103 = vector.shape_cast %102 : vector<1x1x16x16xf32> to vector<16x16xf32>
    %104 = vector.shape_cast %101 : vector<16x16xf32> to vector<1x1x16x16xf32>
    tpu.vector_store %arg5[%c0_43, %c3_44, %c0_45, %c0_46], %104 {strides = array<i32>} : memref<1x8x16x16xf32, #tpu.memory_space<vmem>>, vector<1x1x16x16xf32>,
    %c0_47 = arith.constant 0 : index
    %c4_48 = arith.constant 4 : index
    %c0_49 = arith.constant 0 : index
    %c0_50 = arith.constant 0 : index
    %105 = vector.load %arg5[%c0_47, %c4_48, %c0_49, %c0_50] : memref<1x8x16x16xf32, #tpu.memory_space<vmem>>, vector<1x1x16x16xf32>
    %106 = vector.shape_cast %105 : vector<1x1x16x16xf32> to vector<16x16xf32>
    %c4_51 = arith.constant 4 : index
    %107 = arith.index_cast %arg1 : i32 to index
    %108 = memref.load %arg4[%c4_51, %107] : memref<8x4xf32, #tpu.memory_space<smem>>
    %109 = vector.broadcast %108 : f32 to vector<16x16xf32>
    %110 = arith.mulf %109, %61 : vector<16x16xf32>
    %111 = arith.addf %106, %110 : vector<16x16xf32>
    %c0_52 = arith.constant 0 : index
    %c4_53 = arith.constant 4 : index
    %c0_54 = arith.constant 0 : index
    %c0_55 = arith.constant 0 : index
    %112 = vector.load %arg5[%c0_52, %c4_53, %c0_54, %c0_55] : memref<1x8x16x16xf32, #tpu.memory_space<vmem>>, vector<1x1x16x16xf32>
    %113 = vector.shape_cast %112 : vector<1x1x16x16xf32> to vector<16x16xf32>
    %114 = vector.shape_cast %111 : vector<16x16xf32> to vector<1x1x16x16xf32>
    tpu.vector_store %arg5[%c0_52, %c4_53, %c0_54, %c0_55], %114 {strides = array<i32>} : memref<1x8x16x16xf32, #tpu.memory_space<vmem>>, vector<1x1x16x16xf32>,
    %c0_56 = arith.constant 0 : index
    %c5_57 = arith.constant 5 : index
    %c0_58 = arith.constant 0 : index
    %c0_59 = arith.constant 0 : index
    %115 = vector.load %arg5[%c0_56, %c5_57, %c0_58, %c0_59] : memref<1x8x16x16xf32, #tpu.memory_space<vmem>>, vector<1x1x16x16xf32>
    %116 = vector.shape_cast %115 : vector<1x1x16x16xf32> to vector<16x16xf32>
    %c5_60 = arith.constant 5 : index
    %117 = arith.index_cast %arg1 : i32 to index
    %118 = memref.load %arg4[%c5_60, %117] : memref<8x4xf32, #tpu.memory_space<smem>>
    %119 = vector.broadcast %118 : f32 to vector<16x16xf32>
    %120 = arith.mulf %119, %61 : vector<16x16xf32>
    %121 = arith.addf %116, %120 : vector<16x16xf32>
    %c0_61 = arith.constant 0 : index
    %c5_62 = arith.constant 5 : index
    %c0_63 = arith.constant 0 : index
    %c0_64 = arith.constant 0 : index
    %122 = vector.load %arg5[%c0_61, %c5_62, %c0_63, %c0_64] : memref<1x8x16x16xf32, #tpu.memory_space<vmem>>, vector<1x1x16x16xf32>
    %123 = vector.shape_cast %122 : vector<1x1x16x16xf32> to vector<16x16xf32>
    %124 = vector.shape_cast %121 : vector<16x16xf32> to vector<1x1x16x16xf32>
    tpu.vector_store %arg5[%c0_61, %c5_62, %c0_63, %c0_64], %124 {strides = array<i32>} : memref<1x8x16x16xf32, #tpu.memory_space<vmem>>, vector<1x1x16x16xf32>,
    %c0_65 = arith.constant 0 : index
    %c6_66 = arith.constant 6 : index
    %c0_67 = arith.constant 0 : index
    %c0_68 = arith.constant 0 : index
    %125 = vector.load %arg5[%c0_65, %c6_66, %c0_67, %c0_68] : memref<1x8x16x16xf32, #tpu.memory_space<vmem>>, vector<1x1x16x16xf32>
    %126 = vector.shape_cast %125 : vector<1x1x16x16xf32> to vector<16x16xf32>
    %c6_69 = arith.constant 6 : index
    %127 = arith.index_cast %arg1 : i32 to index
    %128 = memref.load %arg4[%c6_69, %127] : memref<8x4xf32, #tpu.memory_space<smem>>
    %129 = vector.broadcast %128 : f32 to vector<16x16xf32>
    %130 = arith.mulf %129, %61 : vector<16x16xf32>
    %131 = arith.addf %126, %130 : vector<16x16xf32>
    %c0_70 = arith.constant 0 : index
    %c6_71 = arith.constant 6 : index
    %c0_72 = arith.constant 0 : index
    %c0_73 = arith.constant 0 : index
    %132 = vector.load %arg5[%c0_70, %c6_71, %c0_72, %c0_73] : memref<1x8x16x16xf32, #tpu.memory_space<vmem>>, vector<1x1x16x16xf32>
    %133 = vector.shape_cast %132 : vector<1x1x16x16xf32> to vector<16x16xf32>
    %134 = vector.shape_cast %131 : vector<16x16xf32> to vector<1x1x16x16xf32>
    tpu.vector_store %arg5[%c0_70, %c6_71, %c0_72, %c0_73], %134 {strides = array<i32>} : memref<1x8x16x16xf32, #tpu.memory_space<vmem>>, vector<1x1x16x16xf32>,
    %c0_74 = arith.constant 0 : index
    %c7_75 = arith.constant 7 : index
    %c0_76 = arith.constant 0 : index
    %c0_77 = arith.constant 0 : index
    %135 = vector.load %arg5[%c0_74, %c7_75, %c0_76, %c0_77] : memref<1x8x16x16xf32, #tpu.memory_space<vmem>>, vector<1x1x16x16xf32>
    %136 = vector.shape_cast %135 : vector<1x1x16x16xf32> to vector<16x16xf32>
    %c7_78 = arith.constant 7 : index
    %137 = arith.index_cast %arg1 : i32 to index
    %138 = memref.load %arg4[%c7_78, %137] : memref<8x4xf32, #tpu.memory_space<smem>>
    %139 = vector.broadcast %138 : f32 to vector<16x16xf32>
    %140 = arith.mulf %139, %61 : vector<16x16xf32>
    %141 = arith.addf %136, %140 : vector<16x16xf32>
    %c0_79 = arith.constant 0 : index
    %c7_80 = arith.constant 7 : index
    %c0_81 = arith.constant 0 : index
    %c0_82 = arith.constant 0 : index
    %142 = vector.load %arg5[%c0_79, %c7_80, %c0_81, %c0_82] : memref<1x8x16x16xf32, #tpu.memory_space<vmem>>, vector<1x1x16x16xf32>
    %143 = vector.shape_cast %142 : vector<1x1x16x16xf32> to vector<16x16xf32>
    %144 = vector.shape_cast %141 : vector<16x16xf32> to vector<1x1x16x16xf32>
    tpu.vector_store %arg5[%c0_79, %c7_80, %c0_81, %c0_82], %144 {strides = array<i32>} : memref<1x8x16x16xf32, #tpu.memory_space<vmem>>, vector<1x1x16x16xf32>,
    return
  }
  func.func @transform_0(%arg0: i32, %arg1: i32) -> (i32, i32, i32, i32) {
    %c0_i32 = arith.constant 0 : i32
    %c0_i32_0 = arith.constant 0 : i32
    %c0_i32_1 = arith.constant 0 : i32
    return %arg0, %arg1, %c0_i32, %c0_i32_0 : i32, i32, i32, i32
  }
  func.func @transform_1(%arg0: i32, %arg1: i32) -> (i32, i32) {
    %c0_i32 = arith.constant 0 : i32
    %c0_i32_0 = arith.constant 0 : i32
    %c0_i32_1 = arith.constant 0 : i32
    return %c0_i32, %c0_i32_0 : i32, i32
  }
  func.func @transform_2(%arg0: i32, %arg1: i32) -> (i32, i32) {
    %c0_i32 = arith.constant 0 : i32
    %c0_i32_0 = arith.constant 0 : i32
    %c0_i32_1 = arith.constant 0 : i32
    return %c0_i32, %c0_i32_0 : i32, i32
  }
  func.func @transform_3(%arg0: i32, %arg1: i32) -> (i32, i32, i32, i32) {
    %c0_i32 = arith.constant 0 : i32
    %c0_i32_0 = arith.constant 0 : i32
    %c0_i32_1 = arith.constant 0 : i32
    %c0_i32_2 = arith.constant 0 : i32
    return %arg0, %c0_i32, %c0_i32_0, %c0_i32_1 : i32, i32, i32, i32
  }
}

</mosaic_0001>

<bundles_post_ra>
// kernel: tpu_custom_call.1
= control target key start
LH: loop header
LB: loop body
LE: loop exit
PB: predicated region body
PF: predicated region fallthrough
CT: control target
= control target key end

     0   :  { %s1575_s0 = inlined_call_operand.hbm [shape: f32[2,4,16,16], index: 0, kind: input, shape index: {}]   ;;  %s1576_s1 = inlined_call_operand.vmem [shape: f32[4,9], index: 1, kind: input, shape index: {}]   ;;  %s1577_s2 = inlined_call_operand.vmem [shape: f32[8,4], index: 2, kind: input, shape index: {}]   ;;  %s1578_s3 = inlined_call_operand.hbm [shape: f32[2,8,16,16], index: 3, kind: output, shape index: {}]  }
   0x1   :  { %1591 = sst [smem:[#allocation20_spill]] %s1576_s1 }
   0x2   :  { %1592 = sst [smem:[#allocation21_spill]] %s1577_s2 }
   0x3   :  { %8 = vsyncpa [#allocation4], 0 }
   0x4   :  { %10 = vsyncpa [#allocation4 + $0x1], 0 }
   0x5   :  { %11 = vsyncpa [#allocation6], 0 }
   0x6   :  { %12 = vsyncpa [#allocation9], 0 }
   0x7   :  { %13 = vsyncpa [#allocation5], 0 }
   0x8   :  { %15 = vsyncpa [#allocation5 + $0x1], 0  ;;  %s1106_s12 = smov 0   ;;  %s1108_s13 = smov 0  }
   0x9   :  { %s1110_s14 = smov 0   ;;  %s1112_s15 = smov 0  }
   0xa   :  { %s1114_s16 = smov 0   ;;  %s1116_s17 = smov 0  }
   0xb   :  { %s1118_s18 = smov 0   ;;  %s1120_s19 = smov 0  }
   0xc   :  { %s1122_s20 = smov 0   ;;  %s1124_s21 = smov 0  }
   0xd   :  { %s1126_s22 = smov 0  }
   0xe LB: > { %1593 = sst [smem:[#allocation15_spill]] %s1031_s12  ;;  %s676_s23 = sadd.s32 4294967295, %s1071_s22   ;;  %s1071_s22 = sphi %s1126_s22, %s1629_s22   ;;  %s1067_s21 = sphi %s1124_s21, %s1628_s21   ;;  %s1063_s20 = sphi %s1122_s20, %s1620_s20   ;;  %s1059_s19 = sphi %s1120_s19, %s1627_s19   ;;  %s1055_s18 = sphi %s1118_s18, %s1619_s18   ;;  %s1051_s17 = sphi %s1116_s17, %s1626_s17   ;;  %s1047_s16 = sphi %s1114_s16, %s1625_s16   ;;  %s1043_s15 = sphi %s1112_s15, %s1624_s15   ;;  %s1039_s14 = sphi %s1110_s14, %s1623_s14   ;;  %s1035_s13 = sphi %s1108_s13, %s1622_s13   ;;  %s1031_s12 = sphi %s1106_s12, %s1621_s12  }
   0xf   : > { %1594 = sst [smem:[#allocation16_spill]] %s1063_s20  ;;  %s677_s24 = sadd.s32 4294967294, %s1071_s22  }
  0x10   : > { %1595 = sst [smem:[#allocation17_spill]] %s1071_s22  ;;  %p49_p0 = scmp.ne.s32.totalorder %s1051_s17, %s1047_s16 }
  0x11   : > { %p50_p1 = scmp.eq.s32.totalorder %s1071_s22, 0  ;;  %p55_p2 = scmp.ne.s32.totalorder %s1047_s16, %s1043_s15 }
  0x12   : > { %p1166_p3 = scmp.eq.s32.totalorder %s676_s23, 0  ;;  %p120_p5 = scmp.ne.s32.totalorder %s1039_s14, %s1035_s13 }
  0x13   : > { %p1171_p4 = por %p50_p1, %p49_p0  ;;  %p121_p7 = scmp.eq.s32.totalorder %s676_s23, 7 }
  0x14   : > { %s1596_s26 = scalar_select %p1166_p3, 1, 0 }
  0x15   : > { %p1179_p6 = por %p1166_p3, %p55_p2  ;;  %p126_p8 = scmp.ne.s32.totalorder %s1035_s13, %s1031_s12 }
  0x16   : > { %p127_p9 = scmp.eq.s32.totalorder %s677_s24, 7  ;;  %p1185_p10 = por %p121_p7, %p120_p5 }
  0x17   : > { %s1598_s29 = scalar_select %p1179_p6, 1, 0 }
  0x18   : > { %s1599_s30 = scalar_select %p1185_p10, 1, 0 }
  0x19   : > { %p678_p11 = scmp.ge.s32.totalorder %s1071_s22, 1  ;;  %p1190_p12 = por %p127_p9, %p126_p8 }
  0x1a   : > { %p134_p13 = scmp.lt.s32.totalorder %s1071_s22, 9  ;;  %s1602_s1 = sld [smem:[#allocation20_spill]] }
  0x1b   : > { %s1600_s4 = scalar_select %p1190_p12, 1, 0 }
  0x1c   : > { %p1198_p0 = pnand %p678_p11, %p134_p13  ;;  %p778_p2 = scmp.lt.s32.totalorder %s1071_s22, 8 }
  0x1d   : > { %1601 = sst [smem:[#allocation18_spill]] %s1600_s4  ;;  %s1604_s2 = sld [smem:[#allocation21_spill]] }
  0x1e   : > { %s1603_s8 = scalar_select %p1198_p0, 1, 0 }
  0x1f   : > { %p761_p1 = pneg %p1198_p0  ;;  %p1216_p7 = pnand %p778_p2, %p1171_p4 }
  0x20   : > { %s147_s7 = sshll.u32 %s1602_s1, 4  ;;  %s148_s7 = int_to_ptr.vmem [resolvable:$true] %s147_s7 }
  0x21   : > { %p1210_p5 = pnand %p761_p1, %p1166_p3  ;;  %s881_s24 = scalar_lea.vmem %s148_s7, 64 }
  0x22   : > { %s1606_s23 = scalar_select %p1216_p7, 1, 0 }
  0x23   : > { %s158_s11 = sshll.u32 %s1604_s2, 4  ;;  %p882_p8 = scmp.ne.s32.totalorder %s148_s7, %s881_s24  ;;  %s159_s11 = int_to_ptr.vmem [resolvable:$true] %s158_s11 }
  0x24   : > { %p883_p9 = pneg %p1210_p5  ;;  %p889_p12 = scmp.lt.s32.totalorder %s148_s7, %s148_s7 }
  0x25   : > { %p890_p10 = scmp.lt.s32.totalorder %s881_s24, %s881_s24 }
  0x26   : > { %p884_p11 = pnand %p883_p9, %p882_p8 }
  0x27   : > { %p891_p6 = por %p890_p10, %p889_p12 }
  0x28   : > { %p885_p13 = pneg %p884_p11 }
  0x2a   : > { %p892_p1 = pnand %p891_p6, %p885_p13 }
  0x2c   : > { %895 = shalt.err (!%p892_p1)
}
  0x2d   : > { %s1073_s5 = smov [#allocation7]   ;;  %s896_s28 = scalar_lea.vmem %s159_s11, 128 }
  0x2e   : > { %764 = dma.vmem_to_smem (!%p1210_p5), %s148_s7, 64, %s1073_s5, [#allocation6]  }
  0x2f   : > { %p897_p4 = scmp.ne.s32.totalorder %s159_s11, %s896_s28  ;;  %p904_p0 = scmp.lt.s32.totalorder %s159_s11, %s159_s11 }
  0x30   : > { %p905_p7 = scmp.lt.s32.totalorder %s896_s28, %s896_s28 }
  0x31   : > { %p899_p2 = pnand %p897_p4, %p883_p9 }
  0x32   : > { %p906_p8 = por %p905_p7, %p904_p0 }
  0x33   : > { %p900_p3 = pneg %p899_p2 }
  0x35   : > { %p907_p11 = pnand %p906_p8, %p900_p3 }
  0x37   : > { %910 = shalt.err (!%p907_p11)
}
  0x38   : > { %s1074_s6 = smov [#allocation8]   ;;  %s30_s7 = sadd.s32 1, %s1063_s20 }
  0x39   : > { %767 = dma.vmem_to_smem (!%p1210_p5), %s159_s11, 128, %s1074_s6, [#allocation9]  }
  0x3a   : > { %p31_p6 = scmp.ge.s32.totalorder %s30_s7, 4  ;;  %s33_s9 = sadd.s32 1, %s1067_s21 }
  0x3b   : > { %s169_s10 = sand.u32 1, %s1051_s17   ;;  %s683_s24 = sshll.u32 %s1063_s20, 1 }
  0x3c   : > { %s1631_s7 = smov (%p31_p6, %s30_s7), 0  ;;  %s1633_s9 = smov (!%p31_p6, %s33_s9), %s1067_s21 }
  0x3d   : > { %1607 = sst [smem:[#allocation19_spill]] %s1631_s7  ;;  %s38_s15 = ssub.s32 %s1063_s20, %s1631_s7 }
  0x3e   : > { %p35_p3 = scmp.ge.s32.totalorder %s1633_s9, 2  ;;  %s682_s5 = sshll.u32 %s169_s10, 4 }
  0x3f   : > { %s684_s28 = sshll.u32 %s1067_s21, 3  ;;  %s173_s6 = scalar_lea.vmem [#allocation3], %s682_s5 }
  0x40   : > { %s1635_s9 = smov (%p35_p3, %s1633_s9), 0  ;;  %s179_s11 = sadd.s32 %s684_s28, %s683_s24 }
  0x41   : > { %s182_s25 = sshll.u32 %s173_s6, 4  ;;  %s37_s27 = ssub.s32 %s1067_s21, %s1635_s9  ;;  %s1255_s25 = int_to_ptr.vmem [resolvable:$true] %s182_s25 }
  0x42   : > { %s685_s1 = sshll.u32 %s179_s11, 7  ;;  %s39_s2 = sor.u32 %s38_s15, %s37_s27 }
  0x43   : > { %p108_p10 = scmp.eq.s32.totalorder %s37_s27, 0  ;;  %p40_p12 = scmp.eq.s32.totalorder %s39_s2, 0 }
  0x44   : > { %s1243_s7 = scalar_lea.hbm %s1575_s0, %s685_s1  ;;  %s1608_s20 = sadd.s32 1, %s1039_s14 }
  0x45   : > { %s1248_s22 = scalar_select %p108_p10, %s1039_s14, %s1608_s20  }
  0x46   : > { %s1609_s24 = sadd.s32 1, %s1051_s17  ;;  %s1257_s15 = scalar_lea.sflag [#allocation4], %s169_s10 }
  0x47   : > { %s1253_s5 = scalar_select %p40_p12, %s1051_s17, %s1609_s24  }
  0x48   : > { %s911_s2 = scalar_lea.hbm %s1243_s7, 256  ;;  %p1610_p5 = scmp.ne.s32.totalorder %s1606_s23, 0 }
  0x49   : > { %p912_p0 = scmp.ne.s32.totalorder %s1243_s7, %s911_s2  ;;  %s916_s20 = scalar_lea.hbm %s1575_s0, 2048 }
  0x4a   : > { %p913_p7 = pneg %p1610_p5  ;;  %p917_p1 = scmp.lt.u32.totalorder %s1243_s7, %s1575_s0 }
  0x4b   : > { %p918_p4 = scmp.lt.u32.totalorder %s916_s20, %s911_s2  ;;  %p920_p8 = scmp.lt.u32.totalorder %s911_s2, %s1243_s7 }
  0x4c   : > { %p914_p9 = pnand %p913_p7, %p912_p0 }
  0x4d   : > { %p919_p2 = por %p918_p4, %p917_p1 }
  0x4e   : > { %p915_p13 = pneg %p914_p9 }
  0x4f   : > { %p921_p11 = por %p920_p8, %p919_p2 }
  0x51   : > { %p922_p6 = pnand %p921_p11, %p915_p13 }
  0x53   : > { %925 = shalt.err (!%p922_p6)
}
  0x54   : > { %s926_s10 = scalar_lea.vmem %s1255_s25, 256  ;;  %s1075_s28 = smov [#allocation3]  }
  0x55   : > { %p927_p3 = scmp.ne.s32.totalorder %s1255_s25, %s926_s10  ;;  %s931_s11 = sshll.u32 %s1075_s28, 4  ;;  %s932_s11 = int_to_ptr.vmem [resolvable:$false] %s931_s11 }
  0x56   : > { %s933_s6 = scalar_lea.vmem %s932_s11, 512  ;;  %p934_p0 = scmp.lt.s32.totalorder %s1255_s25, %s932_s11 }
  0x57   : > { %p929_p10 = pnand %p927_p3, %p913_p7  ;;  %p935_p9 = scmp.lt.s32.totalorder %s933_s6, %s926_s10 }
  0x59   : > { %p930_p12 = pneg %p929_p10  ;;  %p936_p1 = por %p935_p9, %p934_p0 }
  0x5b   : > { %p937_p4 = pnand %p936_p1, %p930_p12 }
  0x5d   : > { %940 = shalt.err (!%p937_p4)
}
  0x5e   : > { %s1076_s24 = smov 128   ;;  %s1077_s2 = smov 8  }
  0x5f   : > { %771 = dma.hbm_to_vmem [thread:$0]  (!%p1610_p5), %s1243_s7, 256, %s1255_s25, %s1257_s15, %s1076_s24, %s1076_s24, %s1077_s2  }
  0x60   : > { %p1611_p7 = scmp.ne.s32.totalorder %s1603_s8, 0 }
  0x61   : > { %s196_s1 = sand.u32 (!%p1611_p7), 1, %s1047_s16   ;;  %p1612_p13 = scmp.ne.s32.totalorder (!%p1611_p7), %s1598_s29, 0 }
  0x62   : > { %194 = sbr.rel (%p1611_p7) target bundleno = 428 (0x1ac), region = 32  ;;  %s687_s12 = sshll.u32 (!%p1611_p7), %s196_s1, 4 }
  0x63   : > { %s197_s20 = scalar_lea.sflag (!%p1611_p7), [#allocation4], %s196_s1  ;;  %s200_s27 = scalar_lea.vmem (!%p1611_p7), [#allocation3], %s687_s12 }
  0x69   : > { %1014 = dma.done.wait (%p1612_p13), %s197_s20, 256  }
  0x6a   : > { %1016 = vsyncadd (%p1612_p13), %s197_s20, 4294967040  ;;  %p1613_p2 = scmp.ne.s32.totalorder %s1596_s26, 0 }
  0x6c   : > { %1018 = dma.done.wait (%p1613_p2), [#allocation6], 64  }
  0x6d   : > { %1020 = vsyncadd (%p1613_p2), [#allocation6], 4294967232 }
  0x6e   : > { %1022 = dma.done.wait (%p1613_p2), [#allocation9], 128  }
  0x6f   : > { %1024 = vsyncadd (%p1613_p2), [#allocation9], 4294967168 }
  0x70   : > { %213 = sfence }
  0x71   : > { %s229_s25 = sand.u32 1, %s1035_s13   ;;  %p691_p5 = scmp.ne.s32.totalorder %s1055_s18, 0 }
  0x72   : > { %s690_s8 = sshll.u32 %s229_s25, 7  ;;  %vm236_vm0 = vcmask (!%p691_p5), 146432   ;;  %vm239_vm1 = vcmask (!%p691_p5), 140288   ;;  %v1078_v0 = vmov (!%p691_p5), 0.0  }
  0x73   : > { %s1303_s29 = scalar_lea.vmem [#allocation10], %s690_s8  ;;  %235 = sbr.rel (%p691_p5) target bundleno = 122 (0x7a), region = 48  ;;  %237 = vst.msk [vmem:[#allocation2] sm:$0xff] (!%p691_p5), %vm236_vm0, %v1078_v0  ;;  %238 = vst.msk [vmem:[#allocation2 + $0x8] sm:$0xff] (!%p691_p5), %vm236_vm0, %v1078_v0 }
  0x74   : > { %240 = vst.msk [vmem:[#allocation2 + $0x10] sm:$0x3] (!%p691_p5), %vm239_vm1, %v1078_v0 }
  0x7a PF: > { %v241_v1 = vld [vmem:[%s200_s27] sm:$0xff]  ;;  %s1079_s26 = smov 1   ;;  %v242_v2 = vld [vmem:[%s200_s27 + $0x8] sm:$0xff]  ;;  %s1309_s23 = sshll.u32 %s1055_s18, 7  ;;  %vm251_vm2 = vcmask 138248   ;;  %vm303_vm3 = vcmask 1046528  }
  0x7b   : > { %245 = vrot.lane.b32.xlu0 %v241_v1, %s1079_s26  ;;  %s279_s7 = sadd.s32 2, %s1309_s23  ;;  %s264_s15 = sadd.s32 1, %s1309_s23  ;;  %vm366_vm4 = vcmask 1045504   ;;  %vm423_vm5 = vcmask (!%p691_p5), 130048  }
  0x7c   : > { %s1313_s4 = sld [smem:[#allocation7 + %s279_s7]]  ;;  %s294_s10 = sadd.s32 3, %s1309_s23 }
  0x7d   : > { %s313_s28 = sadd.s32 4, %s1309_s23  ;;  %s357_s11 = sadd.s32 6, %s1309_s23 }
  0x7e   : > { %s1318_s6 = sld [smem:[#allocation7 + %s264_s15]]  ;;  %s335_s24 = sadd.s32 5, %s1309_s23 }
  0x7f   : > { %247 = vrot.lane.b32.xlu0 %v242_v2, %s1079_s26  ;;  %s1322_s2 = sld [smem:[#allocation7 + %s1309_s23]]  ;;  %s376_s8 = sadd.s32 7, %s1309_s23 }
  0x80   : > { %s295_s1 = sld [smem:[#allocation7 + %s294_s10]]  ;;  %s398_s7 = sadd.s32 8, %s1309_s23 }
  0x81   : > { %s314_s12 = sld [smem:[#allocation7 + %s313_s28]]  ;;  %s1080_s10 = smov 126  }
  0x82   : > { %s358_s20 = sld [smem:[#allocation7 + %s357_s11]]  ;;  %v281_v5 = vstv %s1313_s4  ;;  %s1081_s28 = smov 127  }
  0x83   : > { %s336_s27 = sld [smem:[#allocation7 + %s335_s24]] }
  0x84   : > { %v266_v6 = vstv %s1318_s6  ;;  %s377_s26 = sld [smem:[#allocation7 + %s376_s8]] }
  0x85   : > { %v259_v7 = vstv %s1322_s2  ;;  %s1329_s15 = sld [smem:[#allocation7 + %s398_s7]] }
  0x86   : > { %v296_v8 = vstv %s295_s1 }
  0x87   : > { %v315_v10 = vstv %s314_s12 }
  0x88   : > { %v359_v11 = vstv %s358_s20 }
  0x89   : > { %v337_v17 = vstv %s336_s27 }
  0x8a   : > { %v378_v28 = vstv %s377_s26 }
  0x8b   : > { %v400_v37 = vstv %s1329_s15 }
  0xed   : > { %v246_v3 = vpop.permute.xlu0 %245 }
  0xee   : > { %252 = vst.msk [vmem:[#allocation2 + $0x1] sm:$0xff] %vm251_vm2, %v246_v3 }
  0xf1   : > { %v248_v4 = vpop.permute.xlu0 %247 }
  0xf2   : > { %253 = vst.msk [vmem:[#allocation2 + $0x9] sm:$0xff] %vm251_vm2, %v248_v4 }
  0xf5   : > { %v254_v9 = vld [vmem:[#allocation2] sm:$0xff] }
  0xf6   : > { %v282_v12 = vmul.f32 %v281_v5, %v254_v9  ;;  %v267_v13 = vmul.f32 %v266_v6, %v254_v9  ;;  %v1331_v14 = vmul.f32 %v259_v7, %v254_v9  ;;  %v297_v15 = vmul.f32 %v296_v8, %v254_v9 }
  0xf7   : > { %v316_v16 = vmul.f32 %v315_v10, %v254_v9  ;;  %v360_v18 = vmul.f32 %v359_v11, %v254_v9  ;;  %v338_v24 = vmul.f32 %v337_v17, %v254_v9  ;;  %v379_v36 = vmul.f32 %v378_v28, %v254_v9 }
  0xf8   : > { %286 = vrot.lane.b32.xlu0 %v282_v12, %s1080_s10  ;;  %271 = vrot.lane.b32.xlu1 %v267_v13, %s1081_s28  ;;  %v304_v38 = vrot.slane %v297_v15, 1  ;;  %v401_v56 = vmul.f32 %v400_v37, %v254_v9 }
  0xf9   : > { %v255_v19 = vld [vmem:[#allocation2 + $0x8] sm:$0xff]  ;;  %v256_v20 = vld [vmem:[#allocation2 + $0x10] sm:$0x3]  ;;  %v322_v26 = vrot.slane %v316_v16, 1  ;;  %v344_v35 = vrot.slane %v338_v24, 1  ;;  %v367_v52 = vrot.slane %v360_v18, 2 }
  0xfa   : > { %v268_v21 = vmul.f32 %v266_v6, %v255_v19  ;;  %v317_v22 = vmul.f32 %v315_v10, %v255_v19  ;;  %v339_v23 = vmul.f32 %v337_v17, %v255_v19  ;;  %v318_v25 = vmul.f32 %v315_v10, %v256_v20 }
  0xfb   : > { %v283_v29 = vmul.f32 %v281_v5, %v255_v19  ;;  %v380_v30 = vmul.f32 %v378_v28, %v255_v19  ;;  %v340_v34 = vmul.f32 %v337_v17, %v256_v20  ;;  %v402_v39 = vmul.f32 %v400_v37, %v255_v19 }
  0xfc   : > { %273 = vrot.lane.b32.xlu1 %v268_v21, %s1081_s28  ;;  %v323_v27 = vrot.slane %v317_v22, 1  ;;  %v345_v32 = vrot.slane %v339_v23, 1  ;;  %v325_v33 = vrot.slane %v318_v25, 1  ;;  %v381_v40 = vmul.f32 %v378_v28, %v256_v20 }
  0xfd   : > { %v261_v41 = vmul.f32 %v259_v7, %v255_v19  ;;  %v298_v42 = vmul.f32 %v296_v8, %v255_v19  ;;  %v386_v43 = vrot.slane %v380_v30, 2  ;;  %v299_v44 = vmul.f32 %v296_v8, %v256_v20 }
  0xfe   : > { %v324_v31 = vsel %vm303_vm3, %v322_v26, %v323_v27  ;;  %v361_v45 = vmul.f32 %v359_v11, %v255_v19  ;;  %v362_v46 = vmul.f32 %v359_v11, %v256_v20  ;;  %v346_v47 = vsel %vm303_vm3, %v344_v35, %v345_v32 }
  0xff   : > { %327 = vrot.lane.b32.xlu0 %v324_v31, %s1081_s28  ;;  %v326_v48 = vsel %vm303_vm3, %v323_v27, %v325_v33  ;;  %v347_v49 = vrot.slane %v340_v34, 1  ;;  %v305_v50 = vrot.slane %v298_v42, 1  ;;  %v307_v51 = vrot.slane %v299_v44, 1 }
 0x100   : > { %288 = vrot.lane.b32.xlu1 %v283_v29, %s1080_s10  ;;  %v368_v53 = vrot.slane %v361_v45, 2  ;;  %v370_v54 = vrot.slane %v362_v46, 2  ;;  %v385_v55 = vrot.slane %v379_v36, 2  ;;  %v408_v62 = vrot.slane %v402_v39, 2 }
 0x101   : > { %v306_v57 = vsel %vm303_vm3, %v304_v38, %v305_v50  ;;  %v308_v58 = vsel %vm303_vm3, %v305_v50, %v307_v51  ;;  %v348_v63 = vsel %vm303_vm3, %v345_v32, %v347_v49  ;;  %v388_v0 = vrot.slane %v381_v40, 2 }
 0x102   : > { %v369_v59 = vsel %vm366_vm4, %v367_v52, %v368_v53  ;;  %v371_v60 = vsel %vm366_vm4, %v368_v53, %v370_v54  ;;  %v387_v61 = vsel %vm366_vm4, %v385_v55, %v386_v43  ;;  %v403_v1 = vmul.f32 %v400_v37, %v256_v20 }
 0x103   : > { %349 = vrot.lane.b32.xlu0 %v346_v47, %s1080_s10  ;;  %v407_v2 = vrot.slane %v401_v56, 2  ;;  %v389_v4 = vsel %vm366_vm4, %v386_v43, %v388_v0  ;;  %v1082_v35 = vmov (!%p691_p5), 0.0  }
 0x104   : > { %329 = vrot.lane.b32.xlu1 %v326_v48, %s1081_s28  ;;  %v410_v5 = vrot.slane %v403_v1, 2  ;;  %424 = vst.msk [vmem:[%s1303_s29] sm:$0xff] (!%p691_p5), %vm423_vm5, %v1082_v35  ;;  %425 = vst.msk [vmem:[%s1303_s29 + $0x8] sm:$0xff] (!%p691_p5), %vm423_vm5, %v1082_v35 }
 0x105   : > { %v409_v3 = vsel %vm366_vm4, %v407_v2, %v408_v62  ;;  %426 = vst.msk [vmem:[%s1303_s29 + $0x10] sm:$0xff] (!%p691_p5), %vm423_vm5, %v1082_v35  ;;  %427 = vst.msk [vmem:[%s1303_s29 + $0x18] sm:$0xff] (!%p691_p5), %vm423_vm5, %v1082_v35 }
 0x106   : > { %v411_v6 = vsel %vm366_vm4, %v408_v62, %v410_v5  ;;  %428 = vst.msk [vmem:[%s1303_s29 + $0x20] sm:$0xff] (!%p691_p5), %vm423_vm5, %v1082_v35  ;;  %429 = vst.msk [vmem:[%s1303_s29 + $0x28] sm:$0xff] (!%p691_p5), %vm423_vm5, %v1082_v35 }
 0x107   : > { %390 = vrot.lane.b32.xlu0 %v387_v61, %s1081_s28  ;;  %430 = vst.msk [vmem:[%s1303_s29 + $0x30] sm:$0xff] (!%p691_p5), %vm423_vm5, %v1082_v35  ;;  %431 = vst.msk [vmem:[%s1303_s29 + $0x38] sm:$0xff] (!%p691_p5), %vm423_vm5, %v1082_v35 }
 0x108   : > { %351 = vrot.lane.b32.xlu1 %v348_v63, %s1080_s10  ;;  %432 = vst.msk [vmem:[%s1303_s29 + $0x40] sm:$0xff] (!%p691_p5), %vm423_vm5, %v1082_v35  ;;  %433 = vst.msk [vmem:[%s1303_s29 + $0x48] sm:$0xff] (!%p691_p5), %vm423_vm5, %v1082_v35 }
 0x109   : > { %434 = vst.msk [vmem:[%s1303_s29 + $0x50] sm:$0xff] (!%p691_p5), %vm423_vm5, %v1082_v35  ;;  %435 = vst.msk [vmem:[%s1303_s29 + $0x58] sm:$0xff] (!%p691_p5), %vm423_vm5, %v1082_v35 }
 0x10a   : > { %436 = vst.msk [vmem:[%s1303_s29 + $0x60] sm:$0xff] (!%p691_p5), %vm423_vm5, %v1082_v35  ;;  %437 = vst.msk [vmem:[%s1303_s29 + $0x68] sm:$0xff] (!%p691_p5), %vm423_vm5, %v1082_v35 }
 0x10b   : > { %412 = vrot.lane.b32.xlu0 %v409_v3, %s1080_s10  ;;  %438 = vst.msk [vmem:[%s1303_s29 + $0x70] sm:$0xff] (!%p691_p5), %vm423_vm5, %v1082_v35  ;;  %439 = vst.msk [vmem:[%s1303_s29 + $0x78] sm:$0xff] (!%p691_p5), %vm423_vm5, %v1082_v35 }
 0x10c   : > { %392 = vrot.lane.b32.xlu1 %v389_v4, %s1081_s28 }
 0x110   : > { %414 = vrot.lane.b32.xlu1 %v411_v6, %s1080_s10 }
 0x16a   : > { %v272_v7 = vpop.permute.xlu1 %271  ;;  %v287_v9 = vpop.permute.xlu0 %286 }
 0x16b   : > { %v277_v8 = vadd.f32 %v272_v7, %v1331_v14 }
 0x16d   : > { %v292_v10 = vadd.f32 %v287_v9, %v277_v8 }
 0x16e   : > { %v274_v11 = vpop.permute.xlu1 %273 }
 0x16f   : > { %v311_v12 = vadd.f32 %v306_v57, %v292_v10  ;;  %v278_v13 = vadd.f32 %v274_v11, %v261_v41 }
 0x171   : > { %v328_v15 = vpop.permute.xlu0 %327 }
 0x172   : > { %v289_v16 = vpop.permute.xlu1 %288  ;;  %v333_v18 = vadd.f32 %v328_v15, %v311_v12 }
 0x173   : > { %v293_v17 = vadd.f32 %v289_v16, %v278_v13 }
 0x175   : > { %v350_v19 = vpop.permute.xlu0 %349  ;;  %v312_v20 = vadd.f32 %v308_v58, %v293_v17 }
 0x176   : > { %v355_v21 = vadd.f32 %v350_v19, %v333_v18  ;;  %v330_v22 = vpop.permute.xlu1 %329 }
 0x177   : > { %v334_v24 = vadd.f32 %v330_v22, %v312_v20 }
 0x178   : > { %v374_v23 = vadd.f32 %v369_v59, %v355_v21 }
 0x179   : > { %v391_v25 = vpop.permute.xlu0 %390 }
 0x17a   : > { %v352_v26 = vpop.permute.xlu1 %351  ;;  %v396_v28 = vadd.f32 %v391_v25, %v374_v23 }
 0x17b   : > { %v356_v27 = vadd.f32 %v352_v26, %v334_v24 }
 0x17d   : > { %v413_v14 = vpop.permute.xlu0 %412  ;;  %v375_v29 = vadd.f32 %v371_v60, %v356_v27  ;;  %422 = sbr.rel (%p691_p5) target bundleno = 388 (0x184), region = 52 }
 0x17e   : > { %v1359_v30 = vadd.f32 %v413_v14, %v396_v28  ;;  %v393_v31 = vpop.permute.xlu1 %392 }
 0x17f   : > { %v397_v32 = vadd.f32 %v393_v31, %v375_v29 }
 0x182   : > { %v415_v33 = vpop.permute.xlu1 %414 }
 0x183   : > { %v1361_v34 = vadd.f32 %v415_v33, %v397_v32 }
 0x184 PF: > { %s442_s23 = sld [smem:[#allocation8 + %s1055_s18]]  ;;  %s454_s4 = sshra.s32 %s1055_s18, 7  ;;  %v440_v36 = vld [vmem:[%s1303_s29] sm:$0xff]  ;;  %v441_v38 = vld [vmem:[%s1303_s29 + $0x8] sm:$0xff]  ;;  %vm448_vm6 = vcmask 130048   ;;  %v694_v43 = vld [vmem:[%s1303_s29 + $0x10] sm:$0xff] }
 0x185   : > { %s1399_s11 = sshll.u32 %s454_s4, 7  ;;  %s1402_s6 = sand.u32 127, %s1055_s18  ;;  %v695_v44 = vld [vmem:[%s1303_s29 + $0x18] sm:$0xff]  ;;  %v699_v46 = vld [vmem:[%s1303_s29 + $0x20] sm:$0xff]  ;;  %v700_v48 = vld [vmem:[%s1303_s29 + $0x28] sm:$0xff] }
 0x186   : > { %s735_s24 = sadd.s32 128, %s1399_s11  ;;  %s737_s2 = sadd.s32 256, %s1399_s11  ;;  %v704_v57 = vld [vmem:[%s1303_s29 + $0x30] sm:$0xff]  ;;  %v705_v58 = vld [vmem:[%s1303_s29 + $0x38] sm:$0xff]  ;;  %v709_v60 = vld [vmem:[%s1303_s29 + $0x40] sm:$0xff] }
 0x187   : > { %s460_s1 = sadd.s32 %s735_s24, %s1402_s6  ;;  %s474_s12 = sadd.s32 %s737_s2, %s1402_s6  ;;  %v710_v62 = vld [vmem:[%s1303_s29 + $0x48] sm:$0xff]  ;;  %v714_v3 = vld [vmem:[%s1303_s29 + $0x50] sm:$0xff]  ;;  %v715_v10 = vld [vmem:[%s1303_s29 + $0x58] sm:$0xff] }
 0x188   : > { %s1408_s20 = sld [smem:[#allocation8 + %s460_s1]]  ;;  %s739_s8 = sadd.s32 384, %s1399_s11  ;;  %v719_v11 = vld [vmem:[%s1303_s29 + $0x60] sm:$0xff]  ;;  %v720_v12 = vld [vmem:[%s1303_s29 + $0x68] sm:$0xff]  ;;  %v724_v23 = vld [vmem:[%s1303_s29 + $0x70] sm:$0xff] }
 0x189   : > { %s1410_s27 = sld [smem:[#allocation8 + %s474_s12]]  ;;  %s741_s26 = sadd.s32 512, %s1399_s11  ;;  %v725_v24 = vld [vmem:[%s1303_s29 + $0x78] sm:$0xff] }
 0x18a   : > { %v443_v37 = vstv %s442_s23  ;;  %s488_s18 = sadd.s32 %s739_s8, %s1402_s6  ;;  %s502_s7 = sadd.s32 %s741_s26, %s1402_s6 }
 0x18b   : > { %v444_v39 = vmul.f32 %v443_v37, %v1359_v30  ;;  %v445_v40 = vmul.f32 %v443_v37, %v1361_v34  ;;  %s1420_s15 = sld [smem:[#allocation8 + %s488_s18]]  ;;  %s743_s28 = sadd.s32 640, %s1399_s11 }
 0x18c   : > { %s1422_s10 = sld [smem:[#allocation8 + %s502_s7]]  ;;  %s745_s23 = sadd.s32 768, %s1399_s11 }
 0x18d   : > { %v446_v41 = vadd.f32 %v444_v39, %v440_v36  ;;  %v447_v42 = vadd.f32 %v445_v40, %v441_v38  ;;  %s516_s4 = sadd.s32 %s743_s28, %s1402_s6  ;;  %s530_s24 = sadd.s32 %s745_s23, %s1402_s6 }
 0x18e   : > { %v462_v45 = vstv %s1408_s20  ;;  %s1434_s2 = sld [smem:[#allocation8 + %s516_s4]]  ;;  %s747_s12 = sadd.s32 896, %s1399_s11 }
 0x18f   : > { %v476_v47 = vstv %s1410_s27  ;;  %s1436_s1 = sld [smem:[#allocation8 + %s530_s24]]  ;;  %449 = vst.msk [vmem:[%s1303_s29] sm:$0xff] %vm448_vm6, %v446_v41  ;;  %450 = vst.msk [vmem:[%s1303_s29 + $0x8] sm:$0xff] %vm448_vm6, %v447_v42  ;;  %v463_v49 = vmul.f32 %v462_v45, %v1359_v30  ;;  %v464_v50 = vmul.f32 %v462_v45, %v1361_v34  ;;  %s544_s20 = sadd.s32 %s747_s12, %s1402_s6 }
 0x190   : > { %v477_v51 = vmul.f32 %v476_v47, %v1359_v30  ;;  %v478_v52 = vmul.f32 %v476_v47, %v1361_v34  ;;  %s1450_s27 = sld [smem:[#allocation8 + %s544_s20]]  ;;  %s748_s11 = sshll.u32 %s1059_s19, 11 }
 0x191   : > { %v465_v53 = vadd.f32 %v694_v43, %v463_v49  ;;  %v466_v54 = vadd.f32 %v695_v44, %v464_v50  ;;  %v490_v59 = vstv %s1420_s15  ;;  %s567_s6 = sshll.u32 %s1303_s29, 4  ;;  %s1504_s26 = scalar_lea.hbm %s1578_s3, %s748_s11  ;;  %s1506_s6 = int_to_ptr.vmem [resolvable:$true] %s567_s6 }
 0x192   : > { %v479_v55 = vadd.f32 %v699_v46, %v477_v51  ;;  %v480_v56 = vadd.f32 %v700_v48, %v478_v52  ;;  %v504_v61 = vstv %s1422_s10  ;;  %v491_v63 = vmul.f32 %v490_v59, %v1359_v30  ;;  %s1514_s18 = scalar_lea.sflag [#allocation5], %s229_s25  ;;  %s941_s7 = scalar_lea.vmem %s1506_s6, 2048 }
 0x193   : > { %697 = vst.msk [vmem:[%s1303_s29 + $0x10] sm:$0xff] %vm448_vm6, %v465_v53  ;;  %698 = vst.msk [vmem:[%s1303_s29 + $0x18] sm:$0xff] %vm448_vm6, %v466_v54  ;;  %v492_v0 = vmul.f32 %v490_v59, %v1361_v34  ;;  %v505_v1 = vmul.f32 %v504_v61, %v1359_v30  ;;  %v506_v2 = vmul.f32 %v504_v61, %v1361_v34  ;;  %p942_p8 = scmp.ne.s32.totalorder %s1506_s6, %s941_s7  ;;  %p1614_p11 = scmp.ne.s32.totalorder %s1599_s30, 0 }
 0x194   : > { %702 = vst.msk [vmem:[%s1303_s29 + $0x20] sm:$0xff] %vm448_vm6, %v479_v55  ;;  %703 = vst.msk [vmem:[%s1303_s29 + $0x28] sm:$0xff] %vm448_vm6, %v480_v56  ;;  %v518_v4 = vstv %s1434_s2  ;;  %v493_v6 = vadd.f32 %v704_v57, %v491_v63  ;;  %s1083_s15 = smov [#allocation10]  }
 0x195   : > { %v532_v5 = vstv %s1436_s1  ;;  %v494_v7 = vadd.f32 %v705_v58, %v492_v0  ;;  %v507_v8 = vadd.f32 %v709_v60, %v505_v1  ;;  %v508_v9 = vadd.f32 %v710_v62, %v506_v2  ;;  %p943_p6 = pnand %p942_p8, %p1614_p11  ;;  %s945_s10 = sshll.u32 %s1083_s15, 4  ;;  %s946_s10 = int_to_ptr.vmem [resolvable:$false] %s945_s10 }
 0x196   : > { %v519_v13 = vmul.f32 %v518_v4, %v1359_v30  ;;  %v520_v15 = vmul.f32 %v518_v4, %v1361_v34  ;;  %v533_v16 = vmul.f32 %v532_v5, %v1359_v30  ;;  %v534_v17 = vmul.f32 %v532_v5, %v1361_v34  ;;  %707 = vst.msk [vmem:[%s1303_s29 + $0x30] sm:$0xff] %vm448_vm6, %v493_v6  ;;  %s947_s28 = scalar_lea.vmem %s946_s10, 4096  ;;  %p948_p10 = scmp.lt.s32.totalorder %s1506_s6, %s946_s10 }
 0x197   : > { %708 = vst.msk [vmem:[%s1303_s29 + $0x38] sm:$0xff] %vm448_vm6, %v494_v7  ;;  %712 = vst.msk [vmem:[%s1303_s29 + $0x40] sm:$0xff] %vm448_vm6, %v507_v8  ;;  %v546_v18 = vstv %s1450_s27  ;;  %p944_p3 = pneg %p943_p6  ;;  %p949_p12 = scmp.lt.s32.totalorder %s947_s28, %s941_s7 }
 0x198   : > { %713 = vst.msk [vmem:[%s1303_s29 + $0x48] sm:$0xff] %vm448_vm6, %v508_v9  ;;  %v521_v19 = vadd.f32 %v714_v3, %v519_v13  ;;  %v522_v20 = vadd.f32 %v715_v10, %v520_v15  ;;  %v535_v21 = vadd.f32 %v719_v11, %v533_v16  ;;  %v536_v22 = vadd.f32 %v720_v12, %v534_v17 }
 0x199   : > { %v547_v25 = vmul.f32 %v546_v18, %v1359_v30  ;;  %v548_v26 = vmul.f32 %v546_v18, %v1361_v34  ;;  %p950_p0 = por %p949_p12, %p948_p10 }
 0x19a   : > { %717 = vst.msk [vmem:[%s1303_s29 + $0x50] sm:$0xff] %vm448_vm6, %v521_v19  ;;  %718 = vst.msk [vmem:[%s1303_s29 + $0x58] sm:$0xff] %vm448_vm6, %v522_v20 }
 0x19b   : > { %722 = vst.msk [vmem:[%s1303_s29 + $0x60] sm:$0xff] %vm448_vm6, %v535_v21  ;;  %723 = vst.msk [vmem:[%s1303_s29 + $0x68] sm:$0xff] %vm448_vm6, %v536_v22  ;;  %v549_v27 = vadd.f32 %v724_v23, %v547_v25  ;;  %v550_v28 = vadd.f32 %v725_v24, %v548_v26  ;;  %p951_p9 = pnand %p950_p0, %p944_p3 }
 0x19d   : > { %727 = vst.msk [vmem:[%s1303_s29 + $0x70] sm:$0xff] %vm448_vm6, %v549_v27  ;;  %728 = vst.msk [vmem:[%s1303_s29 + $0x78] sm:$0xff] %vm448_vm6, %v550_v28 }
 0x19e   : > { %954 = shalt.err (!%p951_p9)
}
 0x19f   : > { %s955_s25 = scalar_lea.hbm %s1504_s26, 2048  ;;  %s959_s4 = scalar_lea.hbm %s1578_s3, 4096 }
 0x1a0   : > { %p956_p1 = scmp.ne.s32.totalorder %s1504_s26, %s955_s25  ;;  %p960_p13 = scmp.lt.u32.totalorder %s1504_s26, %s1578_s3 }
 0x1a1   : > { %p961_p2 = scmp.lt.u32.totalorder %s959_s4, %s955_s25  ;;  %p963_p8 = scmp.lt.u32.totalorder %s955_s25, %s1504_s26 }
 0x1a2   : > { %p957_p4 = pnand %p956_p1, %p1614_p11 }
 0x1a3   : > { %p962_p5 = por %p961_p2, %p960_p13 }
 0x1a4   : > { %p958_p7 = pneg %p957_p4 }
 0x1a5   : > { %p964_p6 = por %p963_p8, %p962_p5 }
 0x1a7   : > { %p965_p3 = pnand %p964_p6, %p958_p7 }
 0x1a9   : > { %968 = shalt.err (!%p965_p3)
}
 0x1aa   : > { %s1084_s1 = smov 128   ;;  %s1085_s12 = smov 8  }
 0x1ab   : > { %759 = dma.vmem_to_hbm [thread:$0]  (%p1614_p11), %s1506_s6, 2048, %s1504_s26, %s1514_s18, %s1084_s1, %s1084_s1, %s1085_s12  }
 0x1ac PF: > { %s1615_s20 = sld [smem:[#allocation17_spill]]  ;;  %s1616_s27 = sld [smem:[#allocation15_spill]] }
 0x1ad   : > { %s1617_s11 = sld [smem:[#allocation18_spill]] }
 0x1b2   : > { %p781_p10 = scmp.ge.s32.totalorder %s1615_s20, 2  ;;  %s582_s19 = sand.u32 1, %s1616_s27  }
 0x1b3   : > { %p1618_p12 = scmp.ne.s32.totalorder %s1617_s11, 0  ;;  %s583_s8 = scalar_lea.sflag [#allocation5], %s582_s19 }
 0x1b5   : > { %p773_p0 = pnand %p781_p10, %p1618_p12 }
 0x1b7   : > { %1026 = dma.done.wait (!%p773_p0), %s583_s8, 2048  }
 0x1b8   : > { %1028 = vsyncadd (!%p773_p0), %s583_s8, 4294965248  ;;  %s21_s7 = sadd.s32 1, %s1615_s20   ;;  %s1619_s18 = sld [smem:[#allocation16_spill]] }
 0x1b9   : > { %p18_p9 = scmp.ge.s32.totalorder %s21_s7, 10   ;;  %s1620_s20 = sld [smem:[#allocation19_spill]] }
 0x1ba   : > { %s1621_s12 = smov %s1035_s13  ;;  %s1622_s13 = smov %s1039_s14 }
 0x1bb   : > { %s1623_s14 = smov %s1248_s22  ;;  %s1624_s15 = smov %s1047_s16 }
 0x1bc   : > { %s1625_s16 = smov %s1051_s17  ;;  %s1626_s17 = smov %s1253_s5 }
 0x1bd   : > { %s1627_s19 = smov %s1067_s21  ;;  %s1628_s21 = smov %s1635_s9 }
 0x1be   : > { %s1629_s22 = smov %s21_s7  ;;  %20 = sbr.rel (!%p18_p9) target bundleno = 14 (0xe), region = 101 }
 0x1c5   :  { %588 = vsyncpa [#allocation4], 1 }
 0x1c6   :  { %590 = vsyncpa [#allocation4 + $0x1], 1 }
 0x1c7   :  { %591 = vsyncpa [#allocation5], 1 }
 0x1c8   :  { %593 = vsyncpa [#allocation5 + $0x1], 1 }
 0x1c9   :  { %594 = vsyncpa [#allocation6], 1 }
 0x1ca   :  { %596 = vsyncpa [#allocation6 + $0x1], 1 }
 0x1cb   :  { %597 = vsyncpa [#allocation9], 1 }

</bundles_post_ra>
